<compile_context>
chip_gen: v6e
topology: v6e:2x2x1
jax: 0.10.0
libtpu: 0.0.40
codegen_flags: <defaults>
</compile_context>

<pallas_src>
import functools

import jax
import jax.numpy as jnp
from jax.experimental import pallas as pl
from jax.experimental.pallas import tpu as pltpu

_LANE = 128          # lane (last-dim) tile for hidden widths
_SUBLANE = 8         # sublane (second-to-last dim) granularity
_MAX_BLOCK_ROWS = 1024  # no-grid threshold and max rows per batch tile


def _round_up(n, m):
    return ((n + m - 1) // m) * m


# ---------------------------------------------------------------------------
# Fused MLP kernel
# ---------------------------------------------------------------------------
def _mlp_kernel(x_ref, *refs, num_layers):
    """refs = (w0, b0, w1, b1, ..., w_{L-1}, b_{L-1}, o_ref). Final layer has no ReLU."""
    o_ref = refs[2 * num_layers]
    h = x_ref[...]
    for i in range(num_layers):           # static unroll over layers
        w = refs[2 * i][...]              # [Din(_pad), Dout(_pad)]
        b = refs[2 * i + 1][...]          # [1, Dout(_pad)] -> broadcast over rows
        h = jnp.dot(h, w, preferred_element_type=jnp.float32) + b
        if i < num_layers - 1:
            h = jnp.maximum(h, 0.0)
    o_ref[...] = h.astype(o_ref.dtype)


def fused_mlp(x, padded_params):
    """x: [B, obs_dim] (unpadded features); padded_params: [(W, b)] with
    W:[Din(_pad), Dout(_pad)], b:[1, Dout(_pad)].  Returns [rows, action_dim]
    where rows >= B (rows == B on the no-grid path)."""
    B, din = x.shape
    num_layers = len(padded_params)
    action_dim = padded_params[-1][0].shape[1]      # last layer Dout is NOT padded
    flat_params = [a for wb in padded_params for a in wb]
    kernel = functools.partial(_mlp_kernel, num_layers=num_layers)

    if B <= _MAX_BLOCK_ROWS:
        # Small/medium batch: single full-array VMEM block, no grid, no padding at all.
        vmem = pl.BlockSpec(memory_space=pltpu.MemorySpace.VMEM)
        return pl.pallas_call(
            kernel,
            out_shape=jax.ShapeDtypeStruct((B, action_dim), x.dtype),
            in_specs=[vmem] * (1 + 2 * num_layers),
            out_specs=vmem,
        )(x, *flat_params)

    # Large batch: tile the batch (sublane) axis. Adaptive tile: >= 2 tiles per call
    # (v7x megacore), tile a multiple of 8, so row-padding waste stays at a few rows.
    nb = max(2, pl.cdiv(B, _MAX_BLOCK_ROWS))
    tile = _round_up(pl.cdiv(B, nb), _SUBLANE)
    rows = nb * tile
    if rows != B:
        x = jnp.zeros((rows, din), x.dtype).at[:B].set(x)

    in_specs = [pl.BlockSpec((tile, din), lambda i: (i, 0))]
    for w, b in padded_params:
        # Constant index_maps: weights/biases are fetched once and stay VMEM-resident.
        in_specs.append(pl.BlockSpec(w.shape, lambda i: (0, 0)))
        in_specs.append(pl.BlockSpec(b.shape, lambda i: (0, 0)))

    return pl.pallas_call(
        kernel,
        out_shape=jax.ShapeDtypeStruct((rows, action_dim), x.dtype),
        grid=(nb,),
        in_specs=in_specs,
        out_specs=pl.BlockSpec((tile, action_dim), lambda i: (i, 0)),
        compiler_params=pltpu.CompilerParams(
            dimension_semantics=("parallel",)),  # batch tiles shard across TCs on v7x
    )(x, *flat_params)


# ---------------------------------------------------------------------------
# Parameter init / padding
# ---------------------------------------------------------------------------
def init_linear_params(key, in_size, out_size, init_w=None):
    """Mirrors nn.Linear default uniform(-1/sqrt(in), 1/sqrt(in)); uniform(-init_w, init_w)
    when init_w is given (only last_fc_log_std uses init_w, matching the reference)."""
    kw, kb = jax.random.split(key)
    bound = (1.0 / jnp.sqrt(in_size)) if init_w is None else init_w
    # stored as [in, out] so the kernel does a plain x @ W
    w = jax.random.uniform(kw, (in_size, out_size), jnp.float32, -bound, bound)
    b = jax.random.uniform(kb, (out_size,), jnp.float32, -bound, bound)
    return w, b


def _pad_linear(w, b, din_pad, dout_pad):
    """Zero-pad W to [din_pad, dout_pad] and reshape/pad b to [1, dout_pad].
    Zero-padded columns + zero bias lanes keep ReLU(0)=0 exact through the stack."""
    din, dout = w.shape
    if (din_pad, dout_pad) != (din, dout):
        wp = jnp.zeros((din_pad, dout_pad), w.dtype).at[:din, :dout].set(w)
    else:
        wp = w
    if dout_pad != dout:
        bp = jnp.zeros((1, dout_pad), b.dtype).at[0, :dout].set(b)
    else:
        bp = b.reshape(1, dout)
    return wp, bp


# ---------------------------------------------------------------------------
# Module
# ---------------------------------------------------------------------------
class ContinueousPolicyPallas:
    """JAX/Pallas re-implementation of ContinueousPolicy's forward pass."""

    def __init__(self, obs_dim, action_dim, hidden_sizes, std=None,
                 init_w=0.001, key=jax.random.PRNGKey(0)):
        self.obs_dim = obs_dim
        self.action_dim = action_dim
        self.std = std
        self.log_std = None
        keys = jax.random.split(key, len(hidden_sizes) + 2)
        self.fc_params = []
        in_size = obs_dim
        for i, hs in enumerate(hidden_sizes):
            self.fc_params.append(init_linear_params(keys[i], in_size, hs))
            in_size = hs
        self.last_fc = init_linear_params(keys[len(hidden_sizes)], in_size, action_dim)
        if std is None:
            last_hidden = hidden_sizes[-1] if len(hidden_sizes) > 0 else obs_dim
            # present in the module's __init__, but unused by forward()
            self.last_fc_log_std = init_linear_params(
                keys[len(hidden_sizes) + 1], last_hidden, action_dim, init_w=init_w)
        else:
            self.log_std = float(jnp.log(std))

        # Pre-pad forward-path parameters once: hidden Dout -> multiple of 128
        # (lane-dense activations); obs_dim and action_dim stay UNPADDED.
        all_layers = list(self.fc_params) + [self.last_fc]
        padded = []
        in_pad = obs_dim
        for idx, (w, b) in enumerate(all_layers):
            dout = w.shape[1]
            is_last = idx == len(all_layers) - 1
            dout_pad = dout if is_last else _round_up(dout, _LANE)
            padded.append(_pad_linear(w, b, in_pad, dout_pad))
            in_pad = dout_pad
        self._padded_params = padded

    def __call__(self, inputs):
        x = jnp.asarray(inputs, dtype=jnp.float32)
        assert x.ndim == 2 and x.shape[1] == self.obs_dim
        B = x.shape[0]
        out = fused_mlp(x, self._padded_params)
        return out[:B]   # no-op on the no-grid path; drops padded rows on the grid path

    def get_actions(self, obs, deterministic: bool):
        obs = jnp.asarray(obs, dtype=jnp.float32)
        return self(obs)

    # TODO(synk): log_prob has no body in the reference module; nothing to port.


def reference_forward(policy, x):
    """Pure-JAX reference of the same forward (for sanity checking)."""
    h = x
    for w, b in policy.fc_params:
        h = jnp.maximum(jnp.dot(h, w, precision=jax.lax.Precision.HIGHEST) + b, 0.0)
    w, b = policy.last_fc
    return jnp.dot(h, w, precision=jax.lax.Precision.HIGHEST) + b


if __name__ == "__main__":
    key = jax.random.PRNGKey(0)
    k_params, k_small, k_med, k_big = jax.random.split(key, 4)

    obs_dim = 16
    action_dim = 4
    hidden_sizes = [32, 32]

    policy = ContinueousPolicyPallas(obs_dim, action_dim, hidden_sizes,
                                     std=None, init_w=0.001, key=k_params)

    # Per-env-step batch: single-block, no-grid, no-padding path.
    x_small = jax.random.normal(k_small, (2, obs_dim), dtype=jnp.float32)
    out_small = jax.block_until_ready(policy(x_small))
    ref_small = reference_forward(policy, x_small)
    assert out_small.shape == (2, action_dim)
    assert jnp.allclose(out_small, ref_small, atol=1e-4, rtol=1e-4)

    # Medium batch (300): still the single-block path — no row padding to 512 anymore.
    x_med = jax.random.normal(k_med, (300, obs_dim), dtype=jnp.float32)
    out_med = jax.block_until_ready(policy(x_med))
    ref_med = reference_forward(policy, x_med)
    assert out_med.shape == (300, action_dim)
    assert jnp.allclose(out_med, ref_med, atol=1e-4, rtol=1e-4)

    # Large batch: exercises the batch-tiled ("parallel") grid path with >= 2 tiles.
    x_big = jax.random.normal(k_big, (2056, obs_dim), dtype=jnp.float32)
    out_big = jax.block_until_ready(policy(x_big))
    ref_big = reference_forward(policy, x_big)
    assert out_big.shape == (2056, action_dim)
    assert jnp.allclose(out_big, ref_big, atol=1e-4, rtol=1e-4)

    print("KERNEL_OK")
</pallas_src>

<mosaic_0001>
module attributes {stable_mosaic.version = 11 : i64} {
  func.func @_mlp_kernel(%arg0: memref<2x16xf32, #tpu.memory_space<vmem>>, %arg1: memref<16x128xf32, #tpu.memory_space<vmem>>, %arg2: memref<1x128xf32, #tpu.memory_space<vmem>>, %arg3: memref<128x128xf32, #tpu.memory_space<vmem>>, %arg4: memref<1x128xf32, #tpu.memory_space<vmem>>, %arg5: memref<128x4xf32, #tpu.memory_space<vmem>>, %arg6: memref<1x4xf32, #tpu.memory_space<vmem>>, %arg7: memref<2x4xf32, #tpu.memory_space<vmem>>) attributes {dimension_semantics = [], scalar_prefetch = 0 : i64, scratch_operands = 0 : i64, tpu.core_type = #tpu.core_type<tc>} {
    %c0 = arith.constant 0 : index
    %c0_0 = arith.constant 0 : index
    %0 = vector.load %arg0[%c0, %c0_0] : memref<2x16xf32, #tpu.memory_space<vmem>>, vector<2x16xf32>
    %c0_1 = arith.constant 0 : index
    %c0_2 = arith.constant 0 : index
    %1 = vector.load %arg1[%c0_1, %c0_2] : memref<16x128xf32, #tpu.memory_space<vmem>>, vector<16x128xf32>
    %c0_3 = arith.constant 0 : index
    %c0_4 = arith.constant 0 : index
    %2 = vector.load %arg2[%c0_3, %c0_4] : memref<1x128xf32, #tpu.memory_space<vmem>>, vector<1x128xf32>
    %cst = arith.constant dense<0.000000e+00> : vector<2x128xf32>
    %3 = tpu.matmul %0, %1, %cst {dimension_numbers = #tpu.dot_dimension_numbers<[1], [0], [0], [1], [0, 0, 1, 1], [], []>} : vector<2x16xf32>, vector<16x128xf32>, vector<2x128xf32> -> vector<2x128xf32>
    %4 = vector.broadcast %2 : vector<1x128xf32> to vector<2x128xf32>
    %5 = arith.addf %3, %4 : vector<2x128xf32>
    %cst_5 = arith.constant 0.000000e+00 : f32
    %6 = vector.broadcast %cst_5 : f32 to vector<2x128xf32>
    %7 = arith.maximumf %5, %6 : vector<2x128xf32>
    %c0_6 = arith.constant 0 : index
    %c0_7 = arith.constant 0 : index
    %8 = vector.load %arg3[%c0_6, %c0_7] : memref<128x128xf32, #tpu.memory_space<vmem>>, vector<128x128xf32>
    %c0_8 = arith.constant 0 : index
    %c0_9 = arith.constant 0 : index
    %9 = vector.load %arg4[%c0_8, %c0_9] : memref<1x128xf32, #tpu.memory_space<vmem>>, vector<1x128xf32>
    %cst_10 = arith.constant dense<0.000000e+00> : vector<2x128xf32>
    %10 = tpu.matmul %7, %8, %cst_10 {dimension_numbers = #tpu.dot_dimension_numbers<[1], [0], [0], [1], [0, 0, 1, 1], [], []>} : vector<2x128xf32>, vector<128x128xf32>, vector<2x128xf32> -> vector<2x128xf32>
    %11 = vector.broadcast %9 : vector<1x128xf32> to vector<2x128xf32>
    %12 = arith.addf %10, %11 : vector<2x128xf32>
    %cst_11 = arith.constant 0.000000e+00 : f32
    %13 = vector.broadcast %cst_11 : f32 to vector<2x128xf32>
    %14 = arith.maximumf %12, %13 : vector<2x128xf32>
    %c0_12 = arith.constant 0 : index
    %c0_13 = arith.constant 0 : index
    %15 = vector.load %arg5[%c0_12, %c0_13] : memref<128x4xf32, #tpu.memory_space<vmem>>, vector<128x4xf32>
    %c0_14 = arith.constant 0 : index
    %c0_15 = arith.constant 0 : index
    %16 = vector.load %arg6[%c0_14, %c0_15] : memref<1x4xf32, #tpu.memory_space<vmem>>, vector<1x4xf32>
    %cst_16 = arith.constant dense<0.000000e+00> : vector<2x4xf32>
    %17 = tpu.matmul %14, %15, %cst_16 {dimension_numbers = #tpu.dot_dimension_numbers<[1], [0], [0], [1], [0, 0, 1, 1], [], []>} : vector<2x128xf32>, vector<128x4xf32>, vector<2x4xf32> -> vector<2x4xf32>
    %18 = vector.broadcast %16 : vector<1x4xf32> to vector<2x4xf32>
    %19 = arith.addf %17, %18 : vector<2x4xf32>
    %c0_17 = arith.constant 0 : index
    %c0_18 = arith.constant 0 : index
    %20 = vector.load %arg7[%c0_17, %c0_18] : memref<2x4xf32, #tpu.memory_space<vmem>>, vector<2x4xf32>
    tpu.vector_store %arg7[%c0_17, %c0_18], %19 {strides = array<i32>} : memref<2x4xf32, #tpu.memory_space<vmem>>, vector<2x4xf32>,
    return
  }
}

</mosaic_0001>

<bundles_post_ra>
// kernel: tpu_custom_call.1
= control target key start
LH: loop header
LB: loop body
LE: loop exit
PB: predicated region body
PF: predicated region fallthrough
CT: control target
= control target key end

     0   :  { %12 = vsyncpa [#allocation3], 0  ;;  %s698_s0 = inlined_call_operand.vmem [shape: f32[2,16], index: 0, kind: input, shape index: {}]   ;;  %s699_s1 = inlined_call_operand.hbm [shape: f32[16,128], index: 1, kind: input, shape index: {}]   ;;  %s700_s2 = inlined_call_operand.vmem [shape: f32[1,128], index: 2, kind: input, shape index: {}]   ;;  %s701_s3 = inlined_call_operand.vmem [shape: f32[128,128], index: 3, kind: input, shape index: {}]   ;;  %s702_s4 = inlined_call_operand.vmem [shape: f32[1,128], index: 4, kind: input, shape index: {}]   ;;  %s703_s5 = inlined_call_operand.vmem [shape: f32[128,4], index: 5, kind: input, shape index: {}]   ;;  %s704_s6 = inlined_call_operand.vmem [shape: f32[1,4], index: 6, kind: input, shape index: {}]   ;;  %s705_s7 = inlined_call_operand.hbm [shape: f32[2,4], index: 7, kind: output, shape index: {}]  }
   0x1   :  { %13 = vsyncpa [#allocation4], 0  ;;  %s498_s24 = smov [#allocation2]  }
   0x2   :  { %s21_s25 = sshll.u32 %s498_s24, 4  ;;  %s22_s25 = int_to_ptr.vmem [resolvable:$true] %s21_s25 }
   0x3   :  { %s462_s26 = scalar_lea.vmem %s22_s25, 256  ;;  %p467_p1 = scmp.lt.s32.totalorder %s22_s25, %s22_s25 }
   0x4   :  { %p463_p0 = scmp.ne.s32.totalorder %s22_s25, %s462_s26  ;;  %p468_p2 = scmp.lt.s32.totalorder %s462_s26, %s462_s26 }
   0x6   :  { %p469_p3 = por %p468_p2, %p467_p1 }
   0x8   :  { %p470_p4 = pnand %p469_p3, %p463_p0 }
   0xa   :  { %473 = shalt.err (!%p470_p4)
}
   0xb   :  { %s499_s27 = smov 128   ;;  %s500_s28 = smov 8  }
   0xc   :  { %27 = dma.hbm_to_vmem [thread:$0]  %s699_s1, 256, %s22_s25, [#allocation3], %s499_s27, %s499_s27, %s500_s28  }
   0xd   :  { %494 = dma.done.wait [#allocation3], 256  }
   0xe   :  { %495 = vsyncadd [#allocation3], 4294967040  ;;  %v501_v0 = vmov 0.0   ;;  %vm502_vm0 = vmmov 0   ;;  %v43_v1 = vld [vmem:[#allocation2 + $0x8] sm:$0xff]  ;;  %v42_v2 = vld [vmem:[#allocation2] sm:$0xff] }
   0xf   :  { %371 = vmatprep.subr.mxu0 %v501_v0  ;;  %375 = vmatprep.mubr.msk.f32.mxu0 %vm502_vm0, %v501_v0  ;;  %v41_v3 = vld [vmem:[%s698_s0] sm:$0x3]  ;;  %vm51_vm1 = vcmask 130048   ;;  %v141_v4 = vld [vmem:[%s701_s3 + $0x78] sm:$0xff]  ;;  %v140_v5 = vld [vmem:[%s701_s3 + $0x70] sm:$0xff]  ;;  %s503_s25 = smov [#allocation5]  }
  0x10   :  { %378 = vmatprep.subr.mxu1 %v501_v0  ;;  %410 = vmatprep.mubr.msk.f32.mxu1 %vm502_vm0, %v501_v0  ;;  %v139_v6 = vld [vmem:[%s701_s3 + $0x68] sm:$0xff]  ;;  %v138_v7 = vld [vmem:[%s701_s3 + $0x60] sm:$0xff]  ;;  %v137_v8 = vld [vmem:[%s701_s3 + $0x58] sm:$0xff]  ;;  %s321_s26 = sshll.u32 %s503_s25, 4  ;;  %vm313_vm2 = vcmask 25600   ;;  %s322_s26 = int_to_ptr.vmem [resolvable:$true] %s321_s26 }
  0x11   :  { %372 = vmatpush3.msra.mxu0 %v43_v1  ;;  %379 = vmatpush3.msra.mxu1 %v141_v4  ;;  %v136_v9 = vld [vmem:[%s701_s3 + $0x50] sm:$0xff]  ;;  %v135_v10 = vld [vmem:[%s701_s3 + $0x48] sm:$0xff]  ;;  %v134_v11 = vld [vmem:[%s701_s3 + $0x40] sm:$0xff]  ;;  %p479_p6 = scmp.lt.s32.totalorder %s322_s26, %s322_s26 }
  0x12   :  { %373 = vmatprep.subr.mxu0 %v501_v0  ;;  %380 = vmatprep.subr.mxu1 %v501_v0  ;;  %v133_v12 = vld [vmem:[%s701_s3 + $0x38] sm:$0xff]  ;;  %v132_v13 = vld [vmem:[%s701_s3 + $0x30] sm:$0xff]  ;;  %v131_v14 = vld [vmem:[%s701_s3 + $0x28] sm:$0xff] }
  0x13   :  { %374 = vmatpush3.msra.mxu0 %v42_v2  ;;  %381 = vmatpush3.msra.mxu1 %v140_v5  ;;  %v130_v15 = vld [vmem:[%s701_s3 + $0x20] sm:$0xff]  ;;  %v129_v16 = vld [vmem:[%s701_s3 + $0x18] sm:$0xff]  ;;  %v128_v17 = vld [vmem:[%s701_s3 + $0x10] sm:$0xff] }
  0x14   :  { %376 = vmatmul.mubr.msk.f32.vlgmr.msra.gmra.mxu0 %vm51_vm1, %v41_v3  ;;  %382 = vmatprep.subr.mxu1 %v501_v0  ;;  %v127_v18 = vld [vmem:[%s701_s3 + $0x8] sm:$0xff]  ;;  %v126_v19 = vld [vmem:[%s701_s3] sm:$0xff]  ;;  %v235_v20 = vld [vmem:[%s703_s5 + $0x78] sm:$0xff] }
  0x15   :  { %413 = vmatprep.subr.mxu0 %v501_v0  ;;  %383 = vmatpush3.msra.mxu1 %v139_v6  ;;  %v234_v21 = vld [vmem:[%s703_s5 + $0x70] sm:$0xff]  ;;  %v233_v22 = vld [vmem:[%s703_s5 + $0x68] sm:$0xff]  ;;  %v232_v23 = vld [vmem:[%s703_s5 + $0x60] sm:$0xff] }
  0x16   :  { %445 = vmatprep.mubr.msk.f32.mxu0 %vm502_vm0, %v501_v0  ;;  %384 = vmatprep.subr.mxu1 %v501_v0  ;;  %v231_v24 = vld [vmem:[%s703_s5 + $0x58] sm:$0xff]  ;;  %v230_v25 = vld [vmem:[%s703_s5 + $0x50] sm:$0xff]  ;;  %v229_v26 = vld [vmem:[%s703_s5 + $0x48] sm:$0xff] }
  0x17   :  { %385 = vmatpush3.msra.mxu1 %v138_v7  ;;  %414 = vmatpush3.msra.mxu0 %v235_v20  ;;  %v228_v27 = vld [vmem:[%s703_s5 + $0x40] sm:$0xff]  ;;  %v227_v28 = vld [vmem:[%s703_s5 + $0x38] sm:$0xff]  ;;  %v226_v29 = vld [vmem:[%s703_s5 + $0x30] sm:$0xff] }
  0x18   :  { %386 = vmatprep.subr.mxu1 %v501_v0  ;;  %415 = vmatprep.subr.mxu0 %v501_v0  ;;  %v225_v30 = vld [vmem:[%s703_s5 + $0x28] sm:$0xff]  ;;  %v224_v31 = vld [vmem:[%s703_s5 + $0x20] sm:$0xff]  ;;  %v223_v32 = vld [vmem:[%s703_s5 + $0x18] sm:$0xff] }
  0x19   :  { %387 = vmatpush3.msra.mxu1 %v137_v8  ;;  %416 = vmatpush3.msra.mxu0 %v234_v21  ;;  %v330_v33 = vld [vmem:[%s700_s2] ss:$0 sm:$0xff]  ;;  %v222_v38 = vld [vmem:[%s703_s5 + $0x10] sm:$0xff]  ;;  %v221_v39 = vld [vmem:[%s703_s5 + $0x8] sm:$0xff] }
  0x1a   :  { %388 = vmatprep.subr.mxu1 %v501_v0  ;;  %417 = vmatprep.subr.mxu0 %v501_v0  ;;  %v220_v40 = vld [vmem:[%s703_s5] sm:$0xff]  ;;  %s474_s5 = scalar_lea.vmem %s322_s26, 32 }
  0x1b   :  { %389 = vmatpush3.msra.mxu1 %v136_v9  ;;  %418 = vmatpush3.msra.mxu0 %v233_v22  ;;  %v332_v41 = vld [vmem:[%s702_s4] ss:$0 sm:$0xff]  ;;  %p475_p5 = scmp.ne.s32.totalorder %s322_s26, %s474_s5  ;;  %p480_p7 = scmp.lt.s32.totalorder %s474_s5, %s474_s5 }
  0x1c   :  { %390 = vmatprep.subr.mxu1 %v501_v0  ;;  %419 = vmatprep.subr.mxu0 %v501_v0  ;;  %v333_v46 = vld [vmem:[%s704_s6] ss:$0 sm:$0xff] }
  0x1d   :  { %391 = vmatpush3.msra.mxu1 %v135_v10  ;;  %420 = vmatpush3.msra.mxu0 %v232_v23  ;;  %p481_p8 = por %p480_p7, %p479_p6 }
  0x1e   :  { %392 = vmatprep.subr.mxu1 %v501_v0  ;;  %421 = vmatprep.subr.mxu0 %v501_v0 }
  0x1f   :  { %393 = vmatpush3.msra.mxu1 %v134_v11  ;;  %422 = vmatpush3.msra.mxu0 %v231_v24  ;;  %p482_p9 = pnand %p481_p8, %p475_p5 }
  0x20   :  { %394 = vmatprep.subr.mxu1 %v501_v0  ;;  %423 = vmatprep.subr.mxu0 %v501_v0 }
  0x21   :  { %395 = vmatpush3.msra.mxu1 %v133_v12  ;;  %424 = vmatpush3.msra.mxu0 %v230_v25 }
  0x22   :  { %396 = vmatprep.subr.mxu1 %v501_v0  ;;  %425 = vmatprep.subr.mxu0 %v501_v0 }
  0x23   :  { %397 = vmatpush3.msra.mxu1 %v132_v13  ;;  %426 = vmatpush3.msra.mxu0 %v229_v26 }
  0x24   :  { %398 = vmatprep.subr.mxu1 %v501_v0  ;;  %427 = vmatprep.subr.mxu0 %v501_v0 }
  0x25   :  { %399 = vmatpush3.msra.mxu1 %v131_v14  ;;  %428 = vmatpush3.msra.mxu0 %v228_v27 }
  0x26   :  { %400 = vmatprep.subr.mxu1 %v501_v0  ;;  %429 = vmatprep.subr.mxu0 %v501_v0 }
  0x27   :  { %401 = vmatpush3.msra.mxu1 %v130_v15  ;;  %430 = vmatpush3.msra.mxu0 %v227_v28 }
  0x28   :  { %402 = vmatprep.subr.mxu1 %v501_v0  ;;  %431 = vmatprep.subr.mxu0 %v501_v0 }
  0x29   :  { %403 = vmatpush3.msra.mxu1 %v129_v16  ;;  %432 = vmatpush3.msra.mxu0 %v226_v29 }
  0x2a   :  { %404 = vmatprep.subr.mxu1 %v501_v0  ;;  %433 = vmatprep.subr.mxu0 %v501_v0 }
  0x2b   :  { %405 = vmatpush3.msra.mxu1 %v128_v17  ;;  %434 = vmatpush3.msra.mxu0 %v225_v30 }
  0x2c   :  { %406 = vmatprep.subr.mxu1 %v501_v0  ;;  %435 = vmatprep.subr.mxu0 %v501_v0 }
  0x2d   :  { %407 = vmatpush3.msra.mxu1 %v127_v18  ;;  %436 = vmatpush3.msra.mxu0 %v224_v31 }
  0x2e   :  { %408 = vmatprep.subr.mxu1 %v501_v0  ;;  %437 = vmatprep.subr.mxu0 %v501_v0 }
  0x2f   :  { %409 = vmatpush3.msra.mxu1 %v126_v19  ;;  %438 = vmatpush3.msra.mxu0 %v223_v32 }
  0x30   :  { %439 = vmatprep.subr.mxu0 %v501_v0 }
  0x31   :  { %440 = vmatpush3.msra.mxu0 %v222_v38 }
  0x32   :  { %441 = vmatprep.subr.mxu0 %v501_v0 }
  0x33   :  { %442 = vmatpush3.msra.mxu0 %v221_v39 }
  0x34   :  { %443 = vmatprep.subr.mxu0 %v501_v0 }
  0x35   :  { %444 = vmatpush3.msra.mxu0 %v220_v40 }
  0xd4   :  { %v121_v34 = vpop.f32.mrf.mxu0 }
  0xd5   :  { %v122_v35 = vadd.f32 %v330_v33, %v121_v34 }
  0xd6   :  { %v377_v36 = vpop.f32.mrf.mxu0 }
  0xd7   :  { %v125_v37 = vmax.f32 %v122_v35, 0.0 }
  0xd9   :  { %411 = vmatmul.mubr.f32.vlgmr.msra.gmra.mxu1 %v125_v37 }
 0x199   :  { %v215_v42 = vpop.f32.mrf.mxu1 }
 0x19a   :  { %v216_v43 = vadd.f32 %v332_v41, %v215_v42 }
 0x19b   :  { %v412_v44 = vpop.f32.mrf.mxu1 }
 0x19c   :  { %v219_v45 = vmax.f32 %v216_v43, 0.0 }
 0x19e   :  { %446 = vmatmul.mubr.f32.vlgmr.msra.gmra.mxu0 %v219_v45 }
 0x25e   :  { %v309_v47 = vpop.f32.mrf.mxu0 }
 0x25f   :  { %v310_v48 = vadd.f32 %v333_v46, %v309_v47 }
 0x260   :  { %v447_v49 = vpop.f32.mrf.mxu0 }
 0x261   :  { %314 = vst.msk [vmem:[#allocation5] sm:$0x3] %vm313_vm2, %v310_v48 }
 0x262   :  { %485 = shalt.err (!%p482_p9)
}
 0x263   :  { %324 = dma.vmem_to_hbm [thread:$0]  %s322_s26, 32, %s705_s7, [#allocation4]  }
 0x264   :  { %496 = dma.done.wait [#allocation4], 32  }
 0x265   :  { %497 = vsyncadd [#allocation4], 4294967264 }
 0x266   :  { %328 = vsyncpa [#allocation3], 1 }
 0x267   :  { %329 = vsyncpa [#allocation4], 1 }

</bundles_post_ra>
